<compile_context>
chip_gen: v7x
topology: tpu7x:2x2x1
jax: 0.10.0
libtpu: 0.0.40
codegen_flags: <defaults>
</compile_context>

<pallas_src>
import jax
import jax.numpy as jnp
from jax import lax
from jax.experimental import pallas as pl
from jax.experimental.pallas import tpu as pltpu

K = 4          # conv kernel size
STRIDE = 2
PAD = 1
EPS = 1e-5     # InstanceNorm2d default eps
NEG_SLOPE = 0.2


def _round_up(x, m):
    return (x + m - 1) // m * m


def _vmem_budget_bytes():
    """~75% of physical VMEM per core (generation aware); conservative fallback."""
    cap = 0
    try:
        info = pltpu.get_tpu_info()
        cap = int(getattr(info, "vmem_capacity_bytes", 0) or 0)
    except Exception:
        cap = 0
    if cap <= 0:
        cap = 64 * 1024 * 1024   # v7x-sized conservative default
    return int(cap * 3 // 4)


def _make_kernel(ho, wo, c4p, np_cols):
    """Kernel for one (batch, Cout-tile) block."""
    ws = wo + 1                         # space-to-depth grid width (1 junk col per row)
    offs = (0, 1, ws, ws + 1)           # flat-spatial offset for (dy, dx) in {0,1}^2
    inv_n = 1.0 / float(ho * wo)

    def kernel(xs_ref, w_ref, o_ref, xcol_ref):
        # xs_ref  : (1, c4p, Lp)      bf16  space-to-depth input, flat spatial (+pad)
        # w_ref   : (tc, 4*c4p)       bf16  fused weights, column = k*c4p + c4
        # o_ref   : (1, tc, np_cols)  f32   conv + instance-norm + leaky-relu
        # xcol_ref: (4*c4p, np_cols)  bf16  fused MXU operand (built once per block)
        for k, off in enumerate(offs):
            xcol_ref[k * c4p:(k + 1) * c4p, :] = xs_ref[0, :, off:off + np_cols]

        # One MXU matmul, K = 4*c4p, f32 accumulation.
        acc = jnp.dot(w_ref[...], xcol_ref[...],
                      preferred_element_type=jnp.float32)          # (tc, np_cols)

        # InstanceNorm2d (affine=False, biased variance) over valid spatial positions;
        # the junk column (j == wo of every ws-wide row) is masked out of the stats.
        col = lax.broadcasted_iota(jnp.int32, (1, np_cols), 1)
        valid = (col % ws) != wo
        mean = jnp.sum(jnp.where(valid, acc, 0.0), axis=1, keepdims=True) * inv_n
        d = acc - mean                                             # reused below
        var = jnp.sum(jnp.where(valid, d * d, 0.0), axis=1, keepdims=True) * inv_n
        y = d * lax.rsqrt(var + EPS)
        o_ref[0] = jnp.maximum(y, NEG_SLOPE * y).astype(o_ref.dtype)

    return kernel


def conv_norm_relu(x, weight, bias=None, *, compute_dtype=jnp.bfloat16):
    """x: (B, Cin, H, W) NCHW. weight: (Cout, Cin, 4, 4). bias is accepted but unused:
    InstanceNorm's mean subtraction cancels a per-channel constant exactly.
    Returns (B, Cout, H//2, W//2) float32, matching the PyTorch module."""
    del bias
    B, Cin, H, W = x.shape
    Cout = weight.shape[0]
    assert weight.shape == (Cout, Cin, K, K)
    assert H % 2 == 0 and W % 2 == 0, "k=4, s=2, p=1 conv assumes even H, W"

    Ho, Wo = H // 2, W // 2
    Hs, Ws = Ho + 1, Wo + 1                  # space-to-depth grid of the padded input
    S = Hs * Ws                              # flattened space-to-depth spatial size
    NP = Ho * Ws                             # flat output cols (1 junk col per row)
    C4 = 4 * Cin
    C4p = _round_up(C4, 16)                  # bf16 sublane-pack / MXU-row alignment
    Lp = _round_up(S + 1, 128)               # max kernel slice end is S+1; lane-pad

    # Cout tiling: InstanceNorm is per-channel, so tiles are independent.  256 matches
    # the v6e/v7x MXU tile; small Cout gets one sublane-aligned tile.
    TC = _round_up(Cout, 8) if Cout <= 256 else 256
    Coutp = _round_up(Cout, TC)
    n_ct = Coutp // TC

    # --- input: pad -> space-to-depth(2) -> (B, 4*Cin, S); channel = (r*2+s)*Cin + c.
    xp = jnp.pad(x.astype(compute_dtype), ((0, 0), (0, 0), (PAD, PAD), (PAD, PAD)))
    xs = xp.reshape(B, Cin, Hs, 2, Ws, 2)            # (b, c, i, r, j, s)
    xs = xs.transpose(0, 3, 5, 1, 2, 4).reshape(B, C4, S)
    xs = jnp.pad(xs, ((0, 0), (0, C4p - C4), (0, Lp - S)))

    # --- weights: (Cout, Cin, 4, 4) -> fused (Coutp, 4*C4p); column = k*C4p + c4 with
    # k = dy*2 + dx and c4 = (r*2+s)*Cin + c  (kh = 2*dy + r, kw = 2*dx + s).
    w2 = weight.reshape(Cout, Cin, 2, 2, 2, 2)       # (o, c, dy, r, dx, s)
    w2 = w2.transpose(0, 2, 4, 3, 5, 1).reshape(Cout, 4, C4)
    w2 = jnp.pad(w2, ((0, Coutp - Cout), (0, 0), (0, C4p - C4)))
    wf = w2.reshape(Coutp, 4 * C4p).astype(compute_dtype)

    kernel = _make_kernel(Ho, Wo, C4p, NP)

    # VMEM: double-buffered blocks + fused-operand scratch + f32 temporaries.
    est = (2 * (C4p * Lp * 2)            # xs blocks
           + 2 * (TC * 4 * C4p * 2)      # weight blocks
           + 2 * (TC * NP * 4)           # output blocks
           + 4 * C4p * NP * 2            # xcol scratch
           + 4 * (TC * NP * 4)           # f32 temporaries (acc, d, y, ...)
           + (2 << 20))
    vmem_limit = int(min(max(est, 32 * 1024 * 1024), _vmem_budget_bytes()))

    out_flat = pl.pallas_call(
        kernel,
        out_shape=jax.ShapeDtypeStruct((B, Coutp, NP), jnp.float32),
        grid_spec=pltpu.PrefetchScalarGridSpec(
            num_scalar_prefetch=0,
            grid=(B, n_ct),
            in_specs=[
                pl.BlockSpec((1, C4p, Lp), lambda b, ct: (b, 0, 0)),
                pl.BlockSpec((TC, 4 * C4p), lambda b, ct: (ct, 0)),
            ],
            out_specs=pl.BlockSpec((1, TC, NP), lambda b, ct: (b, ct, 0)),
            scratch_shapes=[pltpu.VMEM((4 * C4p, NP), compute_dtype)],
        ),
        compiler_params=pltpu.CompilerParams(
            dimension_semantics=("parallel", "parallel"),
            vmem_limit_bytes=vmem_limit,
        ),
    )(xs, wf)

    # (B, Coutp, Ho*(Wo+1)) -> drop junk column per row & padded channels -> NCHW.
    return out_flat.reshape(B, Coutp, Ho, Ws)[:, :Cout, :, :Wo]


def _reference(x, weight, bias):
    """Pure-JAX reference (conv -> instance norm -> leaky relu), using the same bf16
    quantization of the matmul operands as the kernel."""
    xq = x.astype(jnp.bfloat16).astype(jnp.float32)
    wq = weight.astype(jnp.bfloat16).astype(jnp.float32)
    conv = lax.conv_general_dilated(
        xq, wq, window_strides=(STRIDE, STRIDE), padding=((PAD, PAD), (PAD, PAD)),
        dimension_numbers=("NCHW", "OIHW", "NCHW"), precision=lax.Precision.HIGHEST,
    ) + bias.reshape(1, -1, 1, 1)          # bias included: must cancel under the norm
    mean = conv.mean(axis=(2, 3), keepdims=True)
    var = ((conv - mean) ** 2).mean(axis=(2, 3), keepdims=True)
    normed = (conv - mean) * lax.rsqrt(var + EPS)
    return jnp.where(normed >= 0, normed, NEG_SLOPE * normed)


if __name__ == "__main__":
    key = jax.random.PRNGKey(0)
    k_x, k_w, k_b = jax.random.split(key, 3)

    B, Cin, Cout, H, W = 2, 4, 8, 16, 16
    x = jax.random.normal(k_x, (B, Cin, H, W), dtype=jnp.float32)
    # Deterministic synthetic parameters (shapes per nn.Conv2d(Cin, Cout, 4, 2, 1)).
    fan_in = Cin * K * K
    bound = 1.0 / (fan_in ** 0.5)
    weight = jax.random.uniform(k_w, (Cout, Cin, K, K), jnp.float32, -bound, bound)
    bias = jax.random.uniform(k_b, (Cout,), jnp.float32, -bound, bound)

    out = conv_norm_relu(x, weight, bias)
    out = jax.block_until_ready(out)

    ref = _reference(x, weight, bias)
    assert out.shape == (B, Cout, H // 2, W // 2)
    assert jnp.allclose(out, ref, atol=1e-3, rtol=1e-3), float(jnp.max(jnp.abs(out - ref)))

    print("KERNEL_OK")
</pallas_src>

<mosaic_0001>
module attributes {stable_mosaic.version = 11 : i64} {
  func.func @kernel(%arg0: i32, %arg1: i32, %arg2: memref<1x16x128xbf16, #tpu.memory_space<vmem>>, %arg3: memref<8x64xbf16, #tpu.memory_space<vmem>>, %arg4: memref<1x8x72xf32, #tpu.memory_space<vmem>>, %arg5: memref<64x72xbf16, #tpu.memory_space<vmem>>) attributes {dimension_semantics = [#tpu.dimension_semantics<parallel>, #tpu.dimension_semantics<parallel>], iteration_bounds = array<i64: 2, 1>, scalar_prefetch = 0 : i64, scratch_operands = 1 : i64, tpu.core_type = #tpu.core_type<tc>, window_params = [{transform_indices = @transform_0, window_bounds = array<i64: 1, 16, 128>}, {transform_indices = @transform_1, window_bounds = array<i64: 8, 64>}, {transform_indices = @transform_2, window_bounds = array<i64: 1, 8, 72>}]} {
    %c0 = arith.constant 0 : index
    %c0_0 = arith.constant 0 : index
    %c0_1 = arith.constant 0 : index
    %0 = vector.load %arg2[%c0, %c0_0, %c0_1] : memref<1x16x128xbf16, #tpu.memory_space<vmem>>, vector<1x16x72xbf16>
    %1 = vector.shape_cast %0 : vector<1x16x72xbf16> to vector<16x72xbf16>
    %c0_2 = arith.constant 0 : index
    %c0_3 = arith.constant 0 : index
    %2 = vector.load %arg5[%c0_2, %c0_3] : memref<64x72xbf16, #tpu.memory_space<vmem>>, vector<16x72xbf16>
    tpu.vector_store %arg5[%c0_2, %c0_3], %1 {strides = array<i32>} : memref<64x72xbf16, #tpu.memory_space<vmem>>, vector<16x72xbf16>,
    %c0_4 = arith.constant 0 : index
    %c0_5 = arith.constant 0 : index
    %c1 = arith.constant 1 : index
    %3 = vector.load %arg2[%c0_4, %c0_5, %c1] : memref<1x16x128xbf16, #tpu.memory_space<vmem>>, vector<1x16x72xbf16>
    %4 = vector.shape_cast %3 : vector<1x16x72xbf16> to vector<16x72xbf16>
    %c16 = arith.constant 16 : index
    %c0_6 = arith.constant 0 : index
    %5 = vector.load %arg5[%c16, %c0_6] : memref<64x72xbf16, #tpu.memory_space<vmem>>, vector<16x72xbf16>
    tpu.vector_store %arg5[%c16, %c0_6], %4 {strides = array<i32>} : memref<64x72xbf16, #tpu.memory_space<vmem>>, vector<16x72xbf16>,
    %c0_7 = arith.constant 0 : index
    %c0_8 = arith.constant 0 : index
    %c9 = arith.constant 9 : index
    %6 = vector.load %arg2[%c0_7, %c0_8, %c9] : memref<1x16x128xbf16, #tpu.memory_space<vmem>>, vector<1x16x72xbf16>
    %7 = vector.shape_cast %6 : vector<1x16x72xbf16> to vector<16x72xbf16>
    %c32 = arith.constant 32 : index
    %c0_9 = arith.constant 0 : index
    %8 = vector.load %arg5[%c32, %c0_9] : memref<64x72xbf16, #tpu.memory_space<vmem>>, vector<16x72xbf16>
    tpu.vector_store %arg5[%c32, %c0_9], %7 {strides = array<i32>} : memref<64x72xbf16, #tpu.memory_space<vmem>>, vector<16x72xbf16>,
    %c0_10 = arith.constant 0 : index
    %c0_11 = arith.constant 0 : index
    %c10 = arith.constant 10 : index
    %9 = vector.load %arg2[%c0_10, %c0_11, %c10] : memref<1x16x128xbf16, #tpu.memory_space<vmem>>, vector<1x16x72xbf16>
    %10 = vector.shape_cast %9 : vector<1x16x72xbf16> to vector<16x72xbf16>
    %c48 = arith.constant 48 : index
    %c0_12 = arith.constant 0 : index
    %11 = vector.load %arg5[%c48, %c0_12] : memref<64x72xbf16, #tpu.memory_space<vmem>>, vector<16x72xbf16>
    tpu.vector_store %arg5[%c48, %c0_12], %10 {strides = array<i32>} : memref<64x72xbf16, #tpu.memory_space<vmem>>, vector<16x72xbf16>,
    %c0_13 = arith.constant 0 : index
    %c0_14 = arith.constant 0 : index
    %12 = vector.load %arg3[%c0_13, %c0_14] : memref<8x64xbf16, #tpu.memory_space<vmem>>, vector<8x64xbf16>
    %c0_15 = arith.constant 0 : index
    %c0_16 = arith.constant 0 : index
    %13 = vector.load %arg5[%c0_15, %c0_16] : memref<64x72xbf16, #tpu.memory_space<vmem>>, vector<64x72xbf16>
    %cst = arith.constant dense<0.000000e+00> : vector<8x72xf32>
    %14 = tpu.matmul %12, %13, %cst {dimension_numbers = #tpu.dot_dimension_numbers<[1], [0], [0], [1], [0, 0, 1, 1], [], []>} : vector<8x64xbf16>, vector<64x72xbf16>, vector<8x72xf32> -> vector<8x72xf32>
    %15 = tpu.iota {dimensions = array<i32: 1>} : vector<1x72xi32>
    %c9_i32 = arith.constant 9 : i32
    %c0_i32 = arith.constant 0 : i32
    %16 = arith.cmpi eq, %c9_i32, %c0_i32 : i32
    %c1_i32 = arith.constant 1 : i32
    %17 = arith.select %16, %c1_i32, %c9_i32 : i32
    %18 = vector.broadcast %17 : i32 to vector<1x72xi32>
    %19 = arith.remsi %15, %18 : vector<1x72xi32>
    %c0_i32_17 = arith.constant 0 : i32
    %20 = vector.broadcast %c0_i32_17 : i32 to vector<1x72xi32>
    %21 = arith.cmpi ne, %19, %20 : vector<1x72xi32>
    %c0_i32_18 = arith.constant 0 : i32
    %22 = vector.broadcast %c0_i32_18 : i32 to vector<1x72xi32>
    %23 = arith.cmpi slt, %19, %22 : vector<1x72xi32>
    %c0_i32_19 = arith.constant 0 : i32
    %24 = arith.cmpi slt, %17, %c0_i32_19 : i32
    %25 = vector.broadcast %24 : i1 to vector<1x72xi1>
    %26 = vector.broadcast %25 : vector<1x72xi1> to vector<1x72xi1>
    %27 = arith.xori %23, %26 : vector<1x72xi1>
    %28 = arith.andi %27, %21 : vector<1x72xi1>
    %29 = vector.broadcast %17 : i32 to vector<1x72xi32>
    %30 = arith.addi %19, %29 : vector<1x72xi32>
    %31 = arith.select %28, %30, %19 : vector<1x72xi1>, vector<1x72xi32>
    %c8_i32 = arith.constant 8 : i32
    %32 = vector.broadcast %c8_i32 : i32 to vector<1x72xi32>
    %33 = arith.cmpi ne, %31, %32 : vector<1x72xi32>
    %cst_20 = arith.constant 0.000000e+00 : f32
    %34 = vector.shape_cast %33 : vector<1x72xi1> to vector<1x72xi1>
    %35 = vector.broadcast %34 : vector<1x72xi1> to vector<8x72xi1>
    %36 = vector.broadcast %cst_20 : f32 to vector<8x72xf32>
    %37 = arith.select %35, %14, %36 : vector<8x72xi1>, vector<8x72xf32>
    %cst_21 = arith.constant dense<0.000000e+00> : vector<8xf32>
    %38 = vector.multi_reduction <add>, %37, %cst_21 [1] : vector<8x72xf32> to vector<8xf32>
    %39 = vector.shape_cast %38 : vector<8xf32> to vector<8x1xf32>
    %cst_22 = arith.constant 1.562500e-02 : f32
    %40 = vector.broadcast %cst_22 : f32 to vector<8x1xf32>
    %41 = arith.mulf %39, %40 : vector<8x1xf32>
    %42 = vector.broadcast %41 : vector<8x1xf32> to vector<8x72xf32>
    %43 = arith.subf %14, %42 : vector<8x72xf32>
    %44 = arith.mulf %43, %43 : vector<8x72xf32>
    %cst_23 = arith.constant 0.000000e+00 : f32
    %45 = vector.shape_cast %33 : vector<1x72xi1> to vector<1x72xi1>
    %46 = vector.broadcast %45 : vector<1x72xi1> to vector<8x72xi1>
    %47 = vector.broadcast %cst_23 : f32 to vector<8x72xf32>
    %48 = arith.select %46, %44, %47 : vector<8x72xi1>, vector<8x72xf32>
    %cst_24 = arith.constant dense<0.000000e+00> : vector<8xf32>
    %49 = vector.multi_reduction <add>, %48, %cst_24 [1] : vector<8x72xf32> to vector<8xf32>
    %50 = vector.shape_cast %49 : vector<8xf32> to vector<8x1xf32>
    %cst_25 = arith.constant 1.562500e-02 : f32
    %51 = vector.broadcast %cst_25 : f32 to vector<8x1xf32>
    %52 = arith.mulf %50, %51 : vector<8x1xf32>
    %cst_26 = arith.constant 9.99999974E-6 : f32
    %53 = vector.broadcast %cst_26 : f32 to vector<8x1xf32>
    %54 = arith.addf %52, %53 : vector<8x1xf32>
    %55 = math.rsqrt %54 : vector<8x1xf32>
    %56 = vector.broadcast %55 : vector<8x1xf32> to vector<8x72xf32>
    %57 = arith.mulf %43, %56 : vector<8x72xf32>
    %cst_27 = arith.constant 2.000000e-01 : f32
    %58 = vector.broadcast %cst_27 : f32 to vector<8x72xf32>
    %59 = arith.mulf %58, %57 : vector<8x72xf32>
    %60 = arith.maximumf %57, %59 : vector<8x72xf32>
    %c0_28 = arith.constant 0 : index
    %c0_29 = arith.constant 0 : index
    %c0_30 = arith.constant 0 : index
    %61 = vector.load %arg4[%c0_28, %c0_29, %c0_30] : memref<1x8x72xf32, #tpu.memory_space<vmem>>, vector<1x8x72xf32>
    %62 = vector.shape_cast %61 : vector<1x8x72xf32> to vector<8x72xf32>
    %63 = vector.shape_cast %60 : vector<8x72xf32> to vector<1x8x72xf32>
    tpu.vector_store %arg4[%c0_28, %c0_29, %c0_30], %63 {strides = array<i32>} : memref<1x8x72xf32, #tpu.memory_space<vmem>>, vector<1x8x72xf32>,
    return
  }
  func.func @transform_0(%arg0: i32, %arg1: i32) -> (i32, i32, i32) {
    %c0_i32 = arith.constant 0 : i32
    %c0_i32_0 = arith.constant 0 : i32
    %c0_i32_1 = arith.constant 0 : i32
    return %arg0, %c0_i32, %c0_i32_0 : i32, i32, i32
  }
  func.func @transform_1(%arg0: i32, %arg1: i32) -> (i32, i32) {
    %c0_i32 = arith.constant 0 : i32
    %c0_i32_0 = arith.constant 0 : i32
    return %arg1, %c0_i32 : i32, i32
  }
  func.func @transform_2(%arg0: i32, %arg1: i32) -> (i32, i32, i32) {
    %c0_i32 = arith.constant 0 : i32
    %c0_i32_0 = arith.constant 0 : i32
    return %arg0, %arg1, %c0_i32 : i32, i32, i32
  }
}

</mosaic_0001>

<bundles_post_ra>
// kernel: tpu_custom_call.1
= control target key start
LH: loop header
LB: loop body
LE: loop exit
PB: predicated region body
PF: predicated region fallthrough
CT: control target
= control target key end

     0   :  { %7 = vsyncpa [#allocation4], 0  ;;  %s966_s0 = inlined_call_operand.hbm [shape: bf16[2,16,128], index: 0, kind: input, shape index: {}]   ;;  %s967_s1 = inlined_call_operand.hbm [shape: bf16[8,64], index: 1, kind: input, shape index: {}]   ;;  %s968_s2 = inlined_call_operand.hbm [shape: f32[2,8,72], index: 2, kind: output, shape index: {}]  }
   0x1   :  { %9 = vsyncpa [#allocation4 + $0x1], 0 }
   0x2   :  { %10 = vsyncpa [#allocation7], 0 }
   0x3   :  { %11 = vsyncpa [#allocation5], 0 }
   0x4   :  { %13 = vsyncpa [#allocation5 + $0x1], 0  ;;  %s732_s9 = smov 0   ;;  %s734_s10 = smov 0  }
   0x5   :  { %s736_s11 = smov 0   ;;  %s738_s12 = smov 0  }
   0x6   :  { %s740_s13 = smov 0   ;;  %s742_s14 = smov 0  }
   0x7 LB: > { %s434_s15 = sadd.s32 4294967295, %s705_s14   ;;  %s435_s16 = sadd.s32 4294967294, %s705_s14   ;;  %s705_s14 = sphi %s742_s14, %s19_s14   ;;  %s701_s13 = sphi %s740_s13, %s996_s13   ;;  %s697_s12 = sphi %s738_s12, %s995_s12   ;;  %s693_s11 = sphi %s736_s11, %s994_s11   ;;  %s689_s10 = sphi %s734_s10, %s993_s10   ;;  %s685_s9 = sphi %s732_s9, %s992_s9  }
   0x8   : > { %s38_s17 = sadd.s32 1, %s693_s11  ;;  %p45_p0 = scmp.ne.s32.totalorder %s693_s11, %s689_s10 }
   0x9   : > { %p46_p1 = scmp.eq.s32.totalorder %s705_s14, 0  ;;  %p51_p2 = scmp.ne.s32.totalorder %s689_s10, %s685_s9 }
   0xa   : > { %p770_p3 = scmp.eq.s32.totalorder %s434_s15, 0  ;;  %p103_p4 = scmp.eq.s32.totalorder %s434_s15, 1 }
   0xb   : > { %p774_p5 = por %p46_p1, %p45_p0  ;;  %p109_p6 = scmp.eq.s32.totalorder %s435_s16, 1 }
   0xc   : > { %s975_s18 = scalar_select %p770_p3, 1, 0 }
   0xd   : > { %p780_p7 = por %p770_p3, %p51_p2  ;;  %p784_p8 = por %p103_p4, %p45_p0 }
   0xe   : > { %p788_p9 = por %p109_p6, %p51_p2  ;;  %p436_p10 = scmp.ge.s32.totalorder %s705_s14, 1 }
   0xf   : > { %s977_s20 = scalar_select %p780_p7, 1, 0 }
  0x10   : > { %s978_s21 = scalar_select %p784_p8, 1, 0 }
  0x11   : > { %s979_s22 = scalar_select %p788_p9, 1, 0 }
  0x12   : > { %p116_p11 = scmp.lt.s32.totalorder %s705_s14, 3  ;;  %s707_s24 = smov [#allocation6]  }
  0x13   : > { %s131_s25 = sshll.u32 %s707_s24, 4  ;;  %p496_p1 = scmp.lt.s32.totalorder %s705_s14, 2  ;;  %s132_s25 = int_to_ptr.vmem [resolvable:$true] %s131_s25 }
  0x14   : > { %p795_p13 = pnand %p436_p10, %p116_p11  ;;  %s31_s28 = sadd.s32 1, %s701_s13 }
  0x15   : > { %p804_p4 = pnand %p496_p1, %p774_p5  ;;  %p815_p6 = scmp.ge.s32.totalorder %s31_s28, 2 }
  0x16   : > { %s980_s23 = scalar_select %p795_p13, 1, 0 }
  0x17   : > { %p483_p0 = pneg %p795_p13  ;;  %s142_s30 = sand.u32 1, %s693_s11  }
  0x18   : > { %s981_s26 = scalar_select %p804_p4, 1, 0 }
  0x19   : > { %p810_p2 = pnand %p483_p0, %p770_p3  ;;  %s561_s5 = scalar_lea.hbm %s967_s1, 64 }
  0x1a   : > { %s983_s29 = scalar_select %p815_p6, 1, 0 }
  0x1b   : > { %p562_p5 = scmp.ne.s32.totalorder %s967_s1, %s561_s5  ;;  %p563_p10 = pneg %p810_p2 }
  0x1c   : > { %p568_p0 = scmp.lt.u32.totalorder %s561_s5, %s967_s1 }
  0x1d   : > { %p564_p11 = pnand %p563_p10, %p562_p5 }
  0x1f   : > { %p565_p1 = pneg %p564_p11 }
  0x21   : > { %p570_p12 = pnand %p568_p0, %p565_p1 }
  0x23   : > { %573 = shalt.err (!%p570_p12)
}
  0x24   : > { %s574_s16 = scalar_lea.vmem %s132_s25, 64  ;;  %p582_p7 = scmp.lt.s32.totalorder %s132_s25, %s132_s25 }
  0x25   : > { %p575_p9 = scmp.ne.s32.totalorder %s132_s25, %s574_s16  ;;  %p583_p13 = scmp.lt.s32.totalorder %s574_s16, %s574_s16 }
  0x27   : > { %p577_p8 = pnand %p575_p9, %p563_p10  ;;  %p584_p4 = por %p583_p13, %p582_p7 }
  0x29   : > { %p578_p3 = pneg %p577_p8 }
  0x2b   : > { %p585_p6 = pnand %p584_p4, %p578_p3 }
  0x2d   : > { %588 = shalt.err (!%p585_p6)
}
  0x2e   : > { %486 = dma.hbm_to_vmem [thread:$0]  (!%p810_p2), %s967_s1, 64, %s132_s25, [#allocation7]  }
  0x2f   : > { %p984_p9 = scmp.ne.s32.totalorder %s983_s29, 0  ;;  %s439_s3 = sshll.u32 %s142_s30, 3 }
  0x30   : > { %s455_s5 = sshll.u32 %s701_s13, 7  ;;  %s146_s8 = scalar_lea.vmem [#allocation3], %s439_s3 }
  0x31   : > { %s998_s28 = smov (%p984_p9, %s31_s28), 0  ;;  %s846_s7 = scalar_lea.hbm %s966_s0, %s455_s5 }
  0x32   : > { %s35_s4 = ssub.s32 %s701_s13, %s998_s28  ;;  %s153_s15 = sshll.u32 %s146_s8, 4  ;;  %s853_s15 = int_to_ptr.vmem [resolvable:$true] %s153_s15 }
  0x33   : > { %p36_p3 = scmp.eq.s32.totalorder %s35_s4, 0  ;;  %s855_s29 = scalar_lea.sflag [#allocation4], %s142_s30 }
  0x34   : > { %s589_s16 = scalar_lea.hbm %s846_s7, 128  ;;  %p985_p8 = scmp.ne.s32.totalorder %s981_s26, 0 }
  0x35   : > { %s851_s25 = scalar_select %p36_p3, %s693_s11, %s38_s17  }
  0x36   : > { %p590_p7 = scmp.ne.s32.totalorder %s846_s7, %s589_s16  ;;  %p591_p12 = pneg %p985_p8 }
  0x37   : > { %s594_s3 = scalar_lea.hbm %s966_s0, 256  ;;  %p595_p2 = scmp.lt.u32.totalorder %s846_s7, %s966_s0 }
  0x38   : > { %p592_p13 = pnand %p591_p12, %p590_p7  ;;  %p596_p6 = scmp.lt.u32.totalorder %s594_s3, %s589_s16 }
  0x39   : > { %p598_p10 = scmp.lt.u32.totalorder %s589_s16, %s846_s7 }
  0x3a   : > { %p593_p4 = pneg %p592_p13  ;;  %p597_p5 = por %p596_p6, %p595_p2 }
  0x3c   : > { %p599_p11 = por %p598_p10, %p597_p5 }
  0x3e   : > { %p600_p1 = pnand %p599_p11, %p593_p4 }
  0x40   : > { %603 = shalt.err (!%p600_p1)
}
  0x41   : > { %s604_s17 = scalar_lea.vmem %s853_s15, 128  ;;  %s708_s30 = smov [#allocation3]  }
  0x42   : > { %p605_p0 = scmp.ne.s32.totalorder %s853_s15, %s604_s17  ;;  %s609_s27 = sshll.u32 %s708_s30, 4  ;;  %s610_s27 = int_to_ptr.vmem [resolvable:$false] %s609_s27 }
  0x43   : > { %s611_s6 = scalar_lea.vmem %s610_s27, 256  ;;  %p612_p7 = scmp.lt.s32.totalorder %s853_s15, %s610_s27 }
  0x44   : > { %p607_p9 = pnand %p605_p0, %p591_p12  ;;  %p613_p13 = scmp.lt.s32.totalorder %s611_s6, %s604_s17 }
  0x46   : > { %p608_p3 = pneg %p607_p9  ;;  %p614_p2 = por %p613_p13, %p612_p7 }
  0x48   : > { %p615_p6 = pnand %p614_p2, %p608_p3 }
  0x4a   : > { %618 = shalt.err (!%p615_p6)
}
  0x4b   : > { %s709_s8 = smov 64   ;;  %s710_s16 = smov 4  }
  0x4c   : > { %490 = dma.hbm_to_vmem [thread:$0]  (!%p985_p8), %s846_s7, 128, %s853_s15, %s855_s29, %s709_s8, %s709_s8, %s710_s16  }
  0x4d   : > { %p986_p12 = scmp.ne.s32.totalorder %s980_s23, 0 }
  0x4e   : > { %s886_s19 = sand.u32 (!%p986_p12), 1, %s689_s10   ;;  %p987_p4 = scmp.ne.s32.totalorder (!%p986_p12), %s977_s20, 0 }
  0x4f   : > { %165 = sbr.rel (%p986_p12) target bundleno = 766 (0x2fe), region = 28  ;;  %s443_s24 = sshll.u32 (!%p986_p12), %s886_s19, 3 }
  0x50   : > { %s168_s3 = scalar_lea.sflag (!%p986_p12), [#allocation4], %s886_s19  ;;  %s171_s4 = scalar_lea.vmem (!%p986_p12), [#allocation3], %s443_s24 }
  0x56   : > { %672 = dma.done.wait (%p987_p4), %s168_s3, 128  }
  0x57   : > { %674 = vsyncadd (%p987_p4), %s168_s3, 4294967168  ;;  %p988_p8 = scmp.ne.s32.totalorder %s975_s18, 0 }
  0x59   : > { %676 = dma.done.wait (%p988_p8), [#allocation7], 64  }
  0x5a   : > { %678 = vsyncadd (%p988_p8), [#allocation7], 4294967232  ;;  %v711_v0 = vmov 0.0   ;;  %v555_v1 = vld [vmem:[%s171_s4] sm:$0xff]   ;;  %s712_s23 = smov 127   ;;  %vm205_vm0 = vcmask 588800   ;;  %v289_v13 = vlaneseq }
  0x5b   : > { %461 = vmatprep.subr.bf16.mxu0 %v711_v0  ;;  %v556_v2 = vld [vmem:[%s171_s4] sm:$0xff]   ;;  %214 = vrot.lane.b32.xlu0 %v555_v1, %s712_s23  ;;  %s713_s26 = smov 118   ;;  %s714_s20 = smov 119   ;;  %vm715_vm1 = vmmov 0   ;;  %v240_v12 = vld [vmem:[#allocation6] sm:$0xf] }
  0x5c   : > { %v557_v3 = vld [vmem:[%s171_s4] sm:$0xff]   ;;  %469 = vmatprep.mubr.msk.bf16.mxu0 %vm715_vm1, %v711_v0  ;;  %vm245_vm2 = vcmask 523264   ;;  %v290_v14 = vand.u32 127, %v289_v13  ;;  %s452_s18 = sshll.u32 %s697_s12, 7  ;;  %s195_s7 = scalar_lea.vmem [#allocation8], %s443_s24 }
  0x5d   : > { %v558_v4 = vld [vmem:[%s171_s4] sm:$0xff]   ;;  %236 = vrot.lane.b32.xlu1 %v557_v3, %s713_s26  ;;  %s343_s15 = sshll.u32 %s195_s7, 4  ;;  %s916_s17 = scalar_lea.hbm %s968_s2, %s452_s18  ;;  %s918_s15 = int_to_ptr.vmem [resolvable:$true] %s343_s15 }
  0x5e   : > { %206 = vst.msk [vmem:[#allocation2] sm:$0xff] %vm205_vm0, %v558_v4  ;;  %v904_v15 = vmul.u32.u64.low 3817748708, %v290_v14  ;;  %v905_v16 = vmul.u32.u64.high 3817748708, %v290_v14, %v904_v15  ;;  %s329_s30 = scalar_lea.sflag [#allocation5], %s886_s19  ;;  %s619_s27 = scalar_lea.vmem %s918_s15, 128 }
  0x5f   : > { %225 = vrot.lane.b32.xlu0 %v556_v2, %s714_s20  ;;  %p620_p5 = scmp.ne.s32.totalorder %s918_s15, %s619_s27  ;;  %p989_p10 = scmp.ne.s32.totalorder %s978_s21, 0 }
  0x60   : > { %v297_v17 = vshrl.u32 %v905_v16, 3  ;;  %s716_s12 = smov [#allocation8]  }
  0x61   : > { %p621_p11 = pnand %p620_p5, %p989_p10  ;;  %s623_s6 = sshll.u32 %s716_s12, 4  ;;  %s624_s6 = int_to_ptr.vmem [resolvable:$false] %s623_s6 }
  0x62   : > { %v298_v18 = vmul.u32 9, %v297_v17  ;;  %s625_s8 = scalar_lea.vmem %s624_s6, 256  ;;  %p626_p0 = scmp.lt.s32.totalorder %s918_s15, %s624_s6 }
  0x63   : > { %p622_p1 = pneg %p621_p11  ;;  %p627_p9 = scmp.lt.s32.totalorder %s625_s8, %s619_s27 }
  0x64   : > { %v299_v19 = vsub.s32 %v290_v14, %v298_v18 }
  0x65   : > { %v241_v5 = vld [vmem:[#allocation2] sm:$0xff]  ;;  %p628_p3 = por %p627_p9, %p626_p0 }
  0x66   : > { %462 = vmatpush3.bf16.msra.mxu0 %v241_v5  ;;  %vm302_vm3 = vcmp.ne.s32.totalorder %v299_v19, 0  ;;  %vm303_vm4 = vcmp.lt.s32.totalorder %v299_v19, 0  ;;  %v305_v20 = vadd.s32 9, %v299_v19 }
  0x67   : > { %463 = vmatprep.subr.bf16.mxu0 %v711_v0  ;;  %vm304_vm5 = vmand %vm303_vm4, %vm302_vm3  ;;  %p629_p7 = pnand %p628_p3, %p622_p1 }
  0x68   : > { %v306_v21 = vsel %vm304_vm5, %v305_v20, %v299_v19 }
  0x69   : > { %vm307_vm6 = vcmp.ne.s32.totalorder %v306_v21, 8 }
  0xcd   : > { %v215_v6 = vpop.permute.xlu0 %214 }
  0xce   : > { %217 = vst.msk [vmem:[#allocation2 + $0x8] sm:$0xff] %vm205_vm0, %v215_v6 }
  0xcf   : > { %v237_v7 = vpop.permute.xlu1 %236 }
  0xd0   : > { %239 = vst.msk [vmem:[#allocation2 + $0x18] sm:$0xff] %vm205_vm0, %v237_v7 }
  0xd1   : > { %v226_v8 = vpop.permute.xlu0 %225 }
  0xd2   : > { %228 = vst.msk [vmem:[#allocation2 + $0x10] sm:$0xff] %vm205_vm0, %v226_v8 }
  0xd5   : > { %v242_v9 = vld [vmem:[#allocation2 + $0x8] sm:$0xff] }
  0xd6   : > { %464 = vmatpush3.bf16.msra.mxu0 %v242_v9 }
  0xd7   : > { %465 = vmatprep.subr.bf16.mxu0 %v711_v0  ;;  %v244_v11 = vld [vmem:[#allocation2 + $0x18] sm:$0xff] }
  0xd9   : > { %v243_v10 = vld [vmem:[#allocation2 + $0x10] sm:$0xff] }
  0xda   : > { %466 = vmatpush3.bf16.msra.mxu0 %v243_v10 }
  0xdb   : > { %467 = vmatprep.subr.bf16.mxu0 %v711_v0 }
  0xde   : > { %468 = vmatpush3.bf16.msra.mxu0 %v244_v11 }
  0xe1   : > { %470 = vmatmul.mubr.msk.bf16.vlgmr.msra.gmra.mrb[0].mxu0 %vm245_vm2, %v240_v12 }
 0x1b4   : > { %v283_v22 = vpop.f32.mrb[0].mxu0 }
 0x1b5   : > { %v471_v23 = vpop.f32.mrb[1].mxu0  ;;  %v310_v24 = vsel %vm307_vm6, %v283_v22, 0.0 }
 0x1b6   : > { %v286_v25 = vpop.f32.mrb[2].mxu0  ;;  %v311_v26 = vsel %vm205_vm0, %v310_v24, 0.0 }
 0x1b7   : > { %312 = vadd.xlane.f32.xlu1 %v311_v26  ;;  %v472_v27 = vpop.f32.mrb[3].mxu0 }
 0x244   : > { %v313_v28 = vpop.xlane.xlu1 %312 }
 0x245   : > { %v314_v29 = vmul.f32 0.015625, %v313_v28 }
 0x247   : > { %v315_v30 = vsub.f32 %v283_v22, %v314_v29 }
 0x249   : > { %v316_v31 = vmul.f32 %v315_v30, %v315_v30 }
 0x24b   : > { %v317_v32 = vsel %vm307_vm6, %v316_v31, 0.0 }
 0x24c   : > { %v318_v33 = vsel %vm205_vm0, %v317_v32, 0.0 }
 0x24d   : > { %319 = vadd.xlane.f32.xlu0 %v318_v33 }
 0x2da   : > { %v320_v34 = vpop.xlane.xlu0 %319 }
 0x2db   : > { %v321_v35 = vmul.f32 0.015625, %v320_v34 }
 0x2dd   : > { %v322_v36 = vadd.f32 1e-05, %v321_v35 }
 0x2df   : > { %559 = vrsqrt.f32 %v322_v36 }
 0x2e9   : > { %v560_v37 = vpop.eup %559 }
 0x2ea   : > { %v324_v38 = vmul.f32 %v560_v37, %v315_v30 }
 0x2ec   : > { %v325_v39 = vmul.f32 0.2, %v324_v38 }
 0x2ee   : > { %v326_v40 = vmax.f32 %v324_v38, %v325_v39 }
 0x2f0   : > { %327 = vst.msk [vmem:[%s195_s7] sm:$0xff] %vm205_vm0, %v326_v40 }
 0x2f1   : > { %632 = shalt.err (!%p629_p7)
}
 0x2f2   : > { %s633_s16 = scalar_lea.hbm %s916_s17, 128  ;;  %s637_s3 = scalar_lea.hbm %s968_s2, 256 }
 0x2f3   : > { %p634_p13 = scmp.ne.s32.totalorder %s916_s17, %s633_s16  ;;  %p638_p12 = scmp.lt.u32.totalorder %s916_s17, %s968_s2 }
 0x2f4   : > { %p639_p4 = scmp.lt.u32.totalorder %s637_s3, %s633_s16  ;;  %p641_p5 = scmp.lt.u32.totalorder %s633_s16, %s916_s17 }
 0x2f5   : > { %p635_p2 = pnand %p634_p13, %p989_p10 }
 0x2f6   : > { %p640_p8 = por %p639_p4, %p638_p12 }
 0x2f7   : > { %p636_p6 = pneg %p635_p2 }
 0x2f8   : > { %p642_p11 = por %p641_p5, %p640_p8 }
 0x2fa   : > { %p643_p1 = pnand %p642_p11, %p636_p6 }
 0x2fc   : > { %646 = shalt.err (!%p643_p1)
}
 0x2fd   : > { %481 = dma.vmem_to_hbm [thread:$0]  (%p989_p10), %s918_s15, 128, %s916_s17, %s329_s30  }
 0x2fe PF: > { %s355_s26 = sand.u32 1, %s685_s9   ;;  %p990_p0 = scmp.ne.s32.totalorder %s979_s22, 0 }
 0x2ff   : > { %p991_p9 = scmp.ge.s32.totalorder %s705_s14, 2  ;;  %s356_s20 = scalar_lea.sflag [#allocation5], %s355_s26 }
 0x301   : > { %p492_p3 = pnand %p991_p9, %p990_p0 }
 0x303   : > { %680 = dma.done.wait (!%p492_p3), %s356_s20, 128  }
 0x304   : > { %682 = vsyncadd (!%p492_p3), %s356_s20, 4294967168  ;;  %s19_s14 = sadd.s32 1, %s705_s14   ;;  %s992_s9 = smov %s689_s10 }
 0x305   : > { %p16_p7 = scmp.ge.s32.totalorder %s19_s14, 4   ;;  %s993_s10 = smov %s693_s11 }
 0x306   : > { %s994_s11 = smov %s851_s25  ;;  %s995_s12 = smov %s701_s13 }
 0x307   : > { %s996_s13 = smov %s998_s28  ;;  %18 = sbr.rel (!%p16_p7) target bundleno = 7 (0x7), region = 78 }
 0x30e   :  { %361 = vsyncpa [#allocation4], 1 }
 0x30f   :  { %363 = vsyncpa [#allocation4 + $0x1], 1 }
 0x310   :  { %364 = vsyncpa [#allocation7], 1 }
 0x311   :  { %365 = vsyncpa [#allocation5], 1 }
 0x312   :  { %367 = vsyncpa [#allocation5 + $0x1], 1 }

</bundles_post_ra>
